<compile_context>
chip_gen: v5e
topology: v5e:2x2
jax: 0.10.0
libtpu: 0.0.40
codegen_flags: <defaults>
</compile_context>

<pallas_src>
import functools
import math

import jax
import jax.numpy as jnp
from jax.experimental import pallas as pl
from jax.experimental.pallas import tpu as pltpu


_VMEM_LIMIT_BYTES = 32 * 1024 * 1024      # explicit scoped-VMEM limit (safe on v5e/v6e/v7x)
_BLOCK_BUDGET_BYTES = 8 * 1024 * 1024     # target for the double-buffered input block
_LANE = 128
_SUBLANE = 8
# Lane-dense (transposed) last-dim path only pays off while the output traffic
# (1/K of input) is non-negligible; for larger K the plain column store is
# already at the HBM roofline.
_TRANSPOSE_K_MAX = 128


def _round_down(x, m):
    return max(m, (x // m) * m)


# ----------------------------- kernels ------------------------------------ #

def _mean_last_lane_kernel(x_ref, o_ref, *, inv_k):
    # x_ref: (tile_rows, K) -> o_ref: (1, tile_rows), lane-dense output.
    x = x_ref[...].astype(jnp.float32)
    xt = jnp.transpose(x)                              # (K, tile_rows), XLU (hidden under DMA)
    s = jnp.sum(xt, axis=0, keepdims=True)             # (1, tile_rows)
    o_ref[...] = (s * inv_k).astype(o_ref.dtype)


def _mean_last_col_kernel(x_ref, o_ref, *, inv_k):
    # Large-K fallback: output traffic is <= 1/K of the input traffic, so the
    # (tile_rows, 1) store is negligible and we skip the in-VMEM transpose.
    x = x_ref[...].astype(jnp.float32)
    s = jnp.sum(x, axis=-1, keepdims=True)             # (tile_rows, 1)
    o_ref[...] = (s * inv_k).astype(o_ref.dtype)


def _mean_mid_kernel(x_ref, o_ref, *, inv_k, tile_p):
    # x_ref: (tile_p, K, tile_q) -> o_ref: (tile_p, 1, tile_q).
    # Sublane reduction per leading row: lane-dense result with no transpose.
    for p in range(tile_p):                            # static unroll (tile_p <= 32)
        xs = x_ref[p].astype(jnp.float32)              # (K, tile_q)
        s = jnp.sum(xs, axis=0, keepdims=True)         # (1, tile_q)
        o_ref[p] = (s * inv_k).astype(o_ref.dtype)


# ----------------------------- wrappers ------------------------------------ #

def _mean_last_dim(x2d):
    """Mean over the last axis of a (m, k) array; returns shape (m,)."""
    m, k = x2d.shape
    itemsize = x2d.dtype.itemsize
    budget_elems = _BLOCK_BUDGET_BYTES // (2 * itemsize)   # double-buffered input block
    inv_k = 1.0 / k

    if k <= _TRANSPOSE_K_MAX:
        # Lane-dense output path.
        rows_cap = max(_LANE, budget_elems // k)
        tile_rows = min(m, rows_cap, 2048)
        if tile_rows < m:
            tile_rows = _round_down(tile_rows, _LANE)
        grid_m = pl.cdiv(m, tile_rows)
        out = pl.pallas_call(
            functools.partial(_mean_last_lane_kernel, inv_k=inv_k),
            out_shape=jax.ShapeDtypeStruct((1, m), x2d.dtype),
            grid_spec=pltpu.PrefetchScalarGridSpec(
                num_scalar_prefetch=0,
                grid=(grid_m,),
                in_specs=[pl.BlockSpec((tile_rows, k), lambda i: (i, 0))],
                out_specs=pl.BlockSpec((1, tile_rows), lambda i: (0, i)),
            ),
            compiler_params=pltpu.CompilerParams(
                dimension_semantics=("parallel",),
                vmem_limit_bytes=_VMEM_LIMIT_BYTES,
            ),
        )(x2d)
        return out.reshape(m)

    # TODO(synk): add a K-blocking grid axis with an f32 accumulator for K so
    # large that a single (8, K) row block no longer fits VMEM (not reachable
    # for GLCNet-sized inputs).
    rows_cap = max(_SUBLANE, budget_elems // k)
    tile_rows = min(m, rows_cap, 1024)
    if tile_rows < m:
        tile_rows = _round_down(tile_rows, _SUBLANE)
    grid_m = pl.cdiv(m, tile_rows)
    out = pl.pallas_call(
        functools.partial(_mean_last_col_kernel, inv_k=inv_k),
        out_shape=jax.ShapeDtypeStruct((m, 1), x2d.dtype),
        grid_spec=pltpu.PrefetchScalarGridSpec(
            num_scalar_prefetch=0,
            grid=(grid_m,),
            in_specs=[pl.BlockSpec((tile_rows, k), lambda i: (i, 0))],
            out_specs=pl.BlockSpec((tile_rows, 1), lambda i: (i, 0)),
        ),
        compiler_params=pltpu.CompilerParams(
            dimension_semantics=("parallel",),
            vmem_limit_bytes=_VMEM_LIMIT_BYTES,
        ),
    )(x2d)
    return out.reshape(m)


def _mean_mid_dim(x3):
    """Mean over the middle axis of a (p, k, q) array; returns shape (p, 1, q)."""
    p, k, q = x3.shape
    itemsize = x3.dtype.itemsize
    budget_elems = _BLOCK_BUDGET_BYTES // (2 * itemsize)
    inv_k = 1.0 / k

    if q <= 512:
        tile_q = q                                      # full dim -> always layout-legal
    else:
        budget_q = max(_LANE, budget_elems // max(1, k))
        tile_q = min(2048, _round_down(q, _LANE), _round_down(budget_q, _LANE))
    cap_p = max(1, budget_elems // (k * tile_q))
    tile_p = max(1, min(p, cap_p, 32))                  # statically unrolled in kernel

    grid = (pl.cdiv(p, tile_p), pl.cdiv(q, tile_q))
    out = pl.pallas_call(
        functools.partial(_mean_mid_kernel, inv_k=inv_k, tile_p=tile_p),
        out_shape=jax.ShapeDtypeStruct((p, 1, q), x3.dtype),
        grid_spec=pltpu.PrefetchScalarGridSpec(
            num_scalar_prefetch=0,
            grid=grid,
            in_specs=[pl.BlockSpec((tile_p, k, tile_q), lambda i, j: (i, 0, j))],
            out_specs=pl.BlockSpec((tile_p, 1, tile_q), lambda i, j: (i, 0, j)),
        ),
        compiler_params=pltpu.CompilerParams(
            dimension_semantics=("parallel", "parallel"),
            vmem_limit_bytes=_VMEM_LIMIT_BYTES,
        ),
    )(x3)
    return out


@functools.partial(jax.jit, static_argnames=("dim",))
def mean_layer(x, dim):
    """Equivalent of torch.mean(x, dim=dim, keepdim=True)."""
    ndim = x.ndim
    dim = dim % ndim
    shape = x.shape
    k = shape[dim]
    pre = math.prod(shape[:dim])
    post = math.prod(shape[dim + 1:])
    out_shape = shape[:dim] + (1,) + shape[dim + 1:]

    if k == 1:
        # Mean over a size-1 axis is the identity (keepdim already holds).
        return x.reshape(out_shape)
    if post == 1:
        # Reduction axis is (effectively) the trailing / lane axis.
        out = _mean_last_dim(x.reshape(pre, k))          # (pre,)
    else:
        # Reduction axis sits before contiguous trailing dims: reduce it along
        # sublanes in-kernel -- no HBM moveaxis/transpose, lane-dense output.
        out = _mean_mid_dim(x.reshape(pre, k, post))     # (pre, 1, post)
    return out.reshape(out_shape)


if __name__ == "__main__":
    key = jax.random.PRNGKey(0)
    # Small NCHW feature map consistent with GLCNet usage: (B, C, H, W).
    x = jax.random.normal(key, (2, 4, 16, 16), dtype=jnp.float32)

    # dim=3: reduce the trailing (time/width) axis -> lane-dense last-dim kernel.
    y3 = jax.block_until_ready(mean_layer(x, 3))
    assert y3.shape == (2, 4, 16, 1), y3.shape
    assert jnp.allclose(y3, jnp.mean(x, axis=3, keepdims=True), atol=1e-5, rtol=1e-5)

    # dim=1: reduce channels -> sublane-reduction kernel, no HBM transpose.
    y1 = jax.block_until_ready(mean_layer(x, 1))
    assert y1.shape == (2, 1, 16, 16), y1.shape
    assert jnp.allclose(y1, jnp.mean(x, axis=1, keepdims=True), atol=1e-5, rtol=1e-5)

    # dim=2: another middle-axis reduction.
    y2 = jax.block_until_ready(mean_layer(x, 2))
    assert y2.shape == (2, 4, 1, 16), y2.shape
    assert jnp.allclose(y2, jnp.mean(x, axis=2, keepdims=True), atol=1e-5, rtol=1e-5)

    print("KERNEL_OK")
</pallas_src>

<mosaic_0001>
module attributes {stable_mosaic.version = 11 : i64} {
  func.func @_mean_last_lane_kernel(%arg0: i32, %arg1: memref<128x16xf32, #tpu.memory_space<vmem>>, %arg2: memref<1x128xf32, #tpu.memory_space<vmem>>) attributes {dimension_semantics = [#tpu.dimension_semantics<parallel>], iteration_bounds = array<i64: 1>, scalar_prefetch = 0 : i64, scratch_operands = 0 : i64, tpu.core_type = #tpu.core_type<tc>, window_params = [{transform_indices = @transform_0, window_bounds = array<i64: 128, 16>}, {transform_indices = @transform_1, window_bounds = array<i64: 1, 128>}]} {
    %c0 = arith.constant 0 : index
    %c0_0 = arith.constant 0 : index
    %0 = vector.load %arg1[%c0, %c0_0] : memref<128x16xf32, #tpu.memory_space<vmem>>, vector<128x16xf32>
    %1 = tpu.transpose %0, [1, 0] : vector<128x16xf32> -> vector<16x128xf32>
    %cst = arith.constant dense<0.000000e+00> : vector<128xf32>
    %2 = vector.multi_reduction <add>, %1, %cst [0] : vector<16x128xf32> to vector<128xf32>
    %3 = vector.shape_cast %2 : vector<128xf32> to vector<1x128xf32>
    %cst_1 = arith.constant 6.250000e-02 : f32
    %4 = vector.broadcast %cst_1 : f32 to vector<1x128xf32>
    %5 = arith.mulf %3, %4 : vector<1x128xf32>
    %c0_2 = arith.constant 0 : index
    %c0_3 = arith.constant 0 : index
    %6 = vector.load %arg2[%c0_2, %c0_3] : memref<1x128xf32, #tpu.memory_space<vmem>>, vector<1x128xf32>
    tpu.vector_store %arg2[%c0_2, %c0_3], %5 {strides = array<i32>} : memref<1x128xf32, #tpu.memory_space<vmem>>, vector<1x128xf32>,
    return
  }
  func.func @transform_0(%arg0: i32) -> (i32, i32) {
    %c0_i32 = arith.constant 0 : i32
    %c0_i32_0 = arith.constant 0 : i32
    return %arg0, %c0_i32 : i32, i32
  }
  func.func @transform_1(%arg0: i32) -> (i32, i32) {
    %c0_i32 = arith.constant 0 : i32
    %c0_i32_0 = arith.constant 0 : i32
    return %c0_i32, %arg0 : i32, i32
  }
}

</mosaic_0001>

<bundles_post_ra>
// kernel: mean_layer.1
= control target key start
LH: loop header
LB: loop body
LE: loop exit
PB: predicated region body
PF: predicated region fallthrough
CT: control target
= control target key end

     0   :  { %6 = vsyncpa [#allocation3], 0  ;;  %s115_s9 = smov [#allocation2]   ;;  %s116_s11 = smov 128   ;;  %s134_s0 = inlined_call_operand.hbm [shape: f32[128,16], index: 0, kind: input, shape index: {}]   ;;  %s135_s1 = inlined_call_operand.vmem [shape: f32[1,128], index: 1, kind: output, shape index: {}]  }
   0x1   :  { %s11_s8 = sshll.u32 %s134_s0, 4  ;;  %s13_s10 = sshll.u32 %s115_s9, 4  ;;  %s12_s8 = int_to_ptr.hbm [resolvable:$true] %s11_s8  ;;  %s14_s10 = int_to_ptr.vmem [resolvable:$true] %s13_s10 }
   0x2   :  { %s117_s12 = smov 8  }
   0x3   :  { %19 = dma.hbm_to_vmem [thread:$0]  %s12_s8, 2048, %s14_s10, [#allocation3], %s116_s11, %s116_s11, %s117_s12  }
   0x4   :  { %113 = dma.done.wait [#allocation3], 2048  }
   0x5   :  { %114 = vsyncadd [#allocation3], 4294965248  ;;  %v24_v0 = vld [vmem:[#allocation2] sm:$0xff]  ;;  %v25_v1 = vld [vmem:[#allocation2 + $0x8] sm:$0xff] }
   0x6   :  { %40 = vxpose.xlu0.b32.start [1/16] (narrow) %v24_v0, 16  ;;  %v26_v2 = vld [vmem:[#allocation2 + $0x10] sm:$0xff]  ;;  %v27_v3 = vld [vmem:[#allocation2 + $0x18] sm:$0xff]  ;;  %v28_v4 = vld [vmem:[#allocation2 + $0x20] sm:$0xff] }
   0x7   :  { %v29_v5 = vld [vmem:[#allocation2 + $0x28] sm:$0xff]  ;;  %v30_v6 = vld [vmem:[#allocation2 + $0x30] sm:$0xff]  ;;  %v31_v7 = vld [vmem:[#allocation2 + $0x38] sm:$0xff] }
   0x8   :  { %v32_v8 = vld [vmem:[#allocation2 + $0x40] sm:$0xff]  ;;  %v33_v9 = vld [vmem:[#allocation2 + $0x48] sm:$0xff]  ;;  %v34_v10 = vld [vmem:[#allocation2 + $0x50] sm:$0xff] }
   0x9   :  { %v35_v11 = vld [vmem:[#allocation2 + $0x58] sm:$0xff]  ;;  %v36_v12 = vld [vmem:[#allocation2 + $0x60] sm:$0xff]  ;;  %v37_v13 = vld [vmem:[#allocation2 + $0x68] sm:$0xff] }
   0xa   :  { %v38_v14 = vld [vmem:[#allocation2 + $0x70] sm:$0xff]  ;;  %v39_v15 = vld [vmem:[#allocation2 + $0x78] sm:$0xff] }
   0xe   :  { %41 = vxpose.xlu0.b32.cont [2/16] (narrow) %v25_v1, 16 }
  0x16   :  { %42 = vxpose.xlu0.b32.cont [3/16] (narrow) %v26_v2, 16 }
  0x1e   :  { %43 = vxpose.xlu0.b32.cont [4/16] (narrow) %v27_v3, 16 }
  0x26   :  { %44 = vxpose.xlu0.b32.cont [5/16] (narrow) %v28_v4, 16 }
  0x2e   :  { %45 = vxpose.xlu0.b32.cont [6/16] (narrow) %v29_v5, 16 }
  0x36   :  { %46 = vxpose.xlu0.b32.cont [7/16] (narrow) %v30_v6, 16 }
  0x3e   :  { %47 = vxpose.xlu0.b32.cont [8/16] (narrow) %v31_v7, 16 }
  0x46   :  { %48 = vxpose.xlu0.b32.cont [9/16] (narrow) %v32_v8, 16 }
  0x4e   :  { %49 = vxpose.xlu0.b32.cont [10/16] (narrow) %v33_v9, 16 }
  0x56   :  { %50 = vxpose.xlu0.b32.cont [11/16] (narrow) %v34_v10, 16 }
  0x5e   :  { %51 = vxpose.xlu0.b32.cont [12/16] (narrow) %v35_v11, 16 }
  0x66   :  { %52 = vxpose.xlu0.b32.cont [13/16] (narrow) %v36_v12, 16 }
  0x6e   :  { %53 = vxpose.xlu0.b32.cont [14/16] (narrow) %v37_v13, 16 }
  0x76   :  { %54 = vxpose.xlu0.b32.cont [15/16] (narrow) %v38_v14, 16 }
  0x7e   :  { %55 = vxpose.xlu0.b32.end [16/16] (narrow) %v39_v15, 16 }
  0xaa   :  { %v56_v16 = vpop.trf.xlu0 }
  0xb2   :  { %v57_v17 = vpop.trf.xlu0 }
  0xb3   :  { %v72_v18 = vadd.f32 %v57_v17, %v56_v16 }
  0xb5   :  { %v73_v19 = vrot.slane %v72_v18, 4 }
  0xb7   :  { %v74_v20 = vadd.f32 %v73_v19, %v72_v18 }
  0xb9   :  { %v75_v21 = vrot.slane %v74_v20, 2 }
  0xbb   :  { %v76_v22 = vadd.f32 %v75_v21, %v74_v20 }
  0xbd   :  { %v77_v23 = vrot.slane %v76_v22, 1 }
  0xbf   :  { %v78_v24 = vadd.f32 %v77_v23, %v76_v22 }
  0xc1   :  { %v79_v25 = vmul.f32 0.0625, %v78_v24 }
  0xc3   :  { %80 = vst [vmem:[%s135_s1] sm:$0x1] %v79_v25 }
  0xc4   :  { %85 = vsyncpa [#allocation3], 1 }

</bundles_post_ra>
